<compile_context>
chip_gen: v7x
topology: tpu7x:2x2x1
jax: 0.10.0
libtpu: 0.0.40
codegen_flags: <defaults>
</compile_context>

<pallas_src>
import functools

import jax
import jax.numpy as jnp
from jax.experimental import pallas as pl
from jax.experimental.pallas import tpu as pltpu


def _group_norm_kernel(x_ref, w_ref, b_ref, o_ref, *, gsize: int, eps: float):
    # x_ref: (Nb, Gb, Cge, HWe) -- Nb batch elems x Gb groups, lane-dense layout.
    # w_ref / b_ref: (Gb, Cge, 1) per-channel affine params for these groups.
    x = x_ref[...].astype(jnp.float32)

    # Pass 1: per-(batch, group) mean.
    s = jnp.sum(jnp.sum(x, axis=-1, keepdims=True), axis=-2, keepdims=True)
    mean = s * (1.0 / gsize)                                  # (Nb, Gb, 1, 1)

    # Pass 2 (VMEM-resident, hidden under the HBM-bound DMA): unbiased variance.
    d = x - mean
    var = jnp.sum(jnp.sum(d * d, axis=-1, keepdims=True), axis=-2, keepdims=True)
    var = var * (1.0 / (gsize - 1))                           # ddof=1 (torch.std)
    std = jnp.sqrt(jnp.maximum(var, 0.0))
    # eps is added to the *std* (not var) to match the PyTorch module exactly.
    inv = 1.0 / (std + eps)                                   # (Nb, Gb, 1, 1)

    w = w_ref[...].astype(jnp.float32)[None]                  # (1, Gb, Cge, 1)
    b = b_ref[...].astype(jnp.float32)[None]
    scale = w * inv                                           # (Nb, Gb, Cge, 1)
    shift = b - mean * scale                                  # (Nb, Gb, Cge, 1)

    # Single FMA-style epilogue; re-read the (possibly packed) input buffer rather
    # than holding the f32 copy live across both passes (matters for bf16/fp8).
    o_ref[...] = (x_ref[...].astype(jnp.float32) * scale + shift).astype(o_ref.dtype)


def _largest_divisor_at_most(n: int, limit: int) -> int:
    limit = max(1, min(n, limit))
    for d in range(limit, 0, -1):
        if n % d == 0:
            return d
    return 1


def _densify_factor(cg: int, hw: int, itemsize: int) -> int:
    """Smallest k with hw % k == 0, (cg*k) % sublane == 0 and (hw//k) % 128 == 0."""
    sublane = 8 * max(1, 4 // itemsize)          # 8 (f32) / 16 (bf16) / 32 (int8)
    if cg % sublane == 0 and hw % 128 == 0:
        return 1
    for k in range(1, hw + 1):
        if hw % k == 0 and (cg * k) % sublane == 0 and (hw // k) % 128 == 0:
            return k
    return 1                                     # fall back to full-extent blocks


def _vmem_cap_bytes() -> int:
    try:
        cap = int(pltpu.get_tpu_info().vmem_capacity_bytes)
        # Leave headroom for compiler internal scratch: ~40 MiB on v7x, ~80 on v6e.
        return max(16 << 20, (cap * 5) // 8)
    except Exception:
        return 40 << 20                          # conservative; safe on every gen


def group_batchnorm2d(x, weight, bias, *, group_num: int = 16, eps: float = 1e-10):
    """x: (N, C, H, W); weight, bias: (C, 1, 1) (PyTorch parameter shapes)."""
    N, C, H, W = x.shape
    G = group_num
    assert C >= G and C % G == 0
    Cg = C // G
    HW = H * W
    gsize = Cg * HW
    assert gsize > 1, "group size must be > 1 for unbiased std (ddof=1)"

    itemsize = jnp.dtype(x.dtype).itemsize

    # --- Layout densification: (Cg, HW) -> (Cg*k, HW//k), lane- and sublane-dense.
    k = _densify_factor(Cg, HW, itemsize)
    Cge, HWe = Cg * k, HW // k

    xg = x.reshape(N, G, Cge, HWe)
    wg = weight.reshape(G, Cg, 1)
    bg = bias.reshape(G, Cg, 1)
    if k > 1:
        # Channel c occupies rows [c*k, (c+1)*k) of the (Cge, HWe) slab.
        wg = jnp.repeat(wg, k, axis=1)           # (G, Cge, 1)
        bg = jnp.repeat(bg, k, axis=1)

    # --- Block fusion: pack groups (then batch elements) up to ~TARGET bytes/block.
    TARGET = 2 << 20                             # ~2 MiB tiles: near HBM roofline
    group_bytes = Cge * HWe * itemsize
    Gb = _largest_divisor_at_most(G, max(1, TARGET // group_bytes))
    if Gb == G:
        Nb = _largest_divisor_at_most(N, max(1, TARGET // (G * group_bytes)))
    else:
        Nb = 1
    block_bytes = Nb * Gb * group_bytes

    kernel = functools.partial(_group_norm_kernel, gsize=gsize, eps=eps)

    # Pipeline VMEM: 2x input block + 2x output block + params + margin.
    param_bytes = 2 * Gb * Cge * jnp.dtype(weight.dtype).itemsize
    needed = 4 * block_bytes + 4 * param_bytes + (2 << 20)
    vmem_limit = int(min(_vmem_cap_bytes(), max(32 << 20, needed)))

    out = pl.pallas_call(
        kernel,
        out_shape=jax.ShapeDtypeStruct((N, G, Cge, HWe), x.dtype),
        grid_spec=pltpu.PrefetchScalarGridSpec(
            num_scalar_prefetch=0,
            # g is the OUTER axis so the per-group param blocks are constant across
            # the inner (batch) axis and only re-DMA'd when the group block changes.
            grid=(G // Gb, N // Nb),
            in_specs=[
                pl.BlockSpec((Nb, Gb, Cge, HWe), lambda g, n: (n, g, 0, 0)),
                pl.BlockSpec((Gb, Cge, 1), lambda g, n: (g, 0, 0)),
                pl.BlockSpec((Gb, Cge, 1), lambda g, n: (g, 0, 0)),
            ],
            out_specs=pl.BlockSpec((Nb, Gb, Cge, HWe), lambda g, n: (n, g, 0, 0)),
        ),
        compiler_params=pltpu.CompilerParams(
            dimension_semantics=("parallel", "parallel"),
            vmem_limit_bytes=vmem_limit,
        ),
    )(xg, wg, bg)

    return out.reshape(N, C, H, W)


def _reference(x, weight, bias, group_num, eps):
    N, C, H, W = x.shape
    xg = x.reshape(N, group_num, -1)
    mean = jnp.mean(xg, axis=2, keepdims=True)
    std = jnp.std(xg, axis=2, keepdims=True, ddof=1)   # torch.std default: unbiased
    xg = (xg - mean) / (std + eps)
    xr = xg.reshape(N, C, H, W)
    return xr * weight.reshape(1, C, 1, 1) + bias.reshape(1, C, 1, 1)


if __name__ == "__main__":
    eps = 1e-10
    key = jax.random.PRNGKey(0)
    k1, k2, k3, k4, k5 = jax.random.split(key, 5)

    # Case 1: Cg=4, HW=256 -> densified to (8, 128) blocks (k=2), groups+batch fused.
    x1 = jax.random.normal(k1, (2, 16, 16, 16), dtype=jnp.float32)
    w1 = jax.random.normal(k2, (16, 1, 1), dtype=jnp.float32)
    b1 = jnp.zeros((16, 1, 1), dtype=jnp.float32)      # module init: zeros
    out1 = jax.block_until_ready(group_batchnorm2d(x1, w1, b1, group_num=4, eps=eps))
    ref1 = _reference(x1, w1, b1, 4, eps)
    assert out1.shape == x1.shape
    assert jnp.allclose(out1, ref1, atol=1e-5, rtol=1e-5), "case 1 mismatch"

    # Case 2: default group_num=16, Cg=2 (no clean densification) -> fallback path.
    x2 = jax.random.normal(k3, (2, 32, 16, 16), dtype=jnp.float32)
    w2 = jax.random.normal(k4, (32, 1, 1), dtype=jnp.float32)
    b2 = 0.1 * jax.random.normal(k5, (32, 1, 1), dtype=jnp.float32)
    out2 = jax.block_until_ready(group_batchnorm2d(x2, w2, b2, group_num=16, eps=eps))
    ref2 = _reference(x2, w2, b2, 16, eps)
    assert out2.shape == x2.shape
    assert jnp.allclose(out2, ref2, atol=1e-5, rtol=1e-5), "case 2 mismatch"

    print("KERNEL_OK")
</pallas_src>

<mosaic_0001>
module attributes {stable_mosaic.version = 11 : i64} {
  func.func @_group_norm_kernel(%arg0: i32, %arg1: i32, %arg2: memref<2x4x8x128xf32, #tpu.memory_space<vmem>>, %arg3: memref<4x8x1xf32, #tpu.memory_space<vmem>>, %arg4: memref<4x8x1xf32, #tpu.memory_space<vmem>>, %arg5: memref<2x4x8x128xf32, #tpu.memory_space<vmem>>) attributes {dimension_semantics = [#tpu.dimension_semantics<parallel>, #tpu.dimension_semantics<parallel>], iteration_bounds = array<i64: 1, 1>, scalar_prefetch = 0 : i64, scratch_operands = 0 : i64, tpu.core_type = #tpu.core_type<tc>, window_params = [{transform_indices = @transform_0, window_bounds = array<i64: 2, 4, 8, 128>}, {transform_indices = @transform_1, window_bounds = array<i64: 4, 8, 1>}, {transform_indices = @transform_2, window_bounds = array<i64: 4, 8, 1>}, {transform_indices = @transform_3, window_bounds = array<i64: 2, 4, 8, 128>}]} {
    %c0 = arith.constant 0 : index
    %c0_0 = arith.constant 0 : index
    %c0_1 = arith.constant 0 : index
    %c0_2 = arith.constant 0 : index
    %0 = vector.load %arg2[%c0, %c0_0, %c0_1, %c0_2] : memref<2x4x8x128xf32, #tpu.memory_space<vmem>>, vector<2x4x8x128xf32>
    %cst = arith.constant dense<0.000000e+00> : vector<2x4x8xf32>
    %1 = vector.multi_reduction <add>, %0, %cst [3] : vector<2x4x8x128xf32> to vector<2x4x8xf32>
    %2 = vector.shape_cast %1 : vector<2x4x8xf32> to vector<2x4x8x1xf32>
    %cst_3 = arith.constant dense<0.000000e+00> : vector<2x4x1xf32>
    %3 = vector.multi_reduction <add>, %2, %cst_3 [2] : vector<2x4x8x1xf32> to vector<2x4x1xf32>
    %4 = vector.shape_cast %3 : vector<2x4x1xf32> to vector<2x4x1x1xf32>
    %cst_4 = arith.constant 9.765625E-4 : f32
    %5 = vector.broadcast %cst_4 : f32 to vector<2x4x1x1xf32>
    %6 = arith.mulf %4, %5 : vector<2x4x1x1xf32>
    %7 = vector.broadcast %6 : vector<2x4x1x1xf32> to vector<2x4x8x128xf32>
    %8 = arith.subf %0, %7 : vector<2x4x8x128xf32>
    %9 = arith.mulf %8, %8 : vector<2x4x8x128xf32>
    %cst_5 = arith.constant dense<0.000000e+00> : vector<2x4x8xf32>
    %10 = vector.multi_reduction <add>, %9, %cst_5 [3] : vector<2x4x8x128xf32> to vector<2x4x8xf32>
    %11 = vector.shape_cast %10 : vector<2x4x8xf32> to vector<2x4x8x1xf32>
    %cst_6 = arith.constant dense<0.000000e+00> : vector<2x4x1xf32>
    %12 = vector.multi_reduction <add>, %11, %cst_6 [2] : vector<2x4x8x1xf32> to vector<2x4x1xf32>
    %13 = vector.shape_cast %12 : vector<2x4x1xf32> to vector<2x4x1x1xf32>
    %cst_7 = arith.constant 9.77517105E-4 : f32
    %14 = vector.broadcast %cst_7 : f32 to vector<2x4x1x1xf32>
    %15 = arith.mulf %13, %14 : vector<2x4x1x1xf32>
    %cst_8 = arith.constant 0.000000e+00 : f32
    %16 = vector.broadcast %cst_8 : f32 to vector<2x4x1x1xf32>
    %17 = arith.maximumf %15, %16 : vector<2x4x1x1xf32>
    %18 = math.sqrt %17 : vector<2x4x1x1xf32>
    %cst_9 = arith.constant 1.000000e-10 : f32
    %19 = vector.broadcast %cst_9 : f32 to vector<2x4x1x1xf32>
    %20 = arith.addf %18, %19 : vector<2x4x1x1xf32>
    %cst_10 = arith.constant 1.000000e+00 : f32
    %21 = vector.broadcast %cst_10 : f32 to vector<2x4x1x1xf32>
    %22 = arith.divf %21, %20 : vector<2x4x1x1xf32>
    %c0_11 = arith.constant 0 : index
    %c0_12 = arith.constant 0 : index
    %c0_13 = arith.constant 0 : index
    %23 = vector.load %arg3[%c0_11, %c0_12, %c0_13] : memref<4x8x1xf32, #tpu.memory_space<vmem>>, vector<4x8x1xf32>
    %24 = vector.shape_cast %23 : vector<4x8x1xf32> to vector<1x4x8x1xf32>
    %c0_14 = arith.constant 0 : index
    %c0_15 = arith.constant 0 : index
    %c0_16 = arith.constant 0 : index
    %25 = vector.load %arg4[%c0_14, %c0_15, %c0_16] : memref<4x8x1xf32, #tpu.memory_space<vmem>>, vector<4x8x1xf32>
    %26 = vector.shape_cast %25 : vector<4x8x1xf32> to vector<1x4x8x1xf32>
    %27 = vector.broadcast %24 : vector<1x4x8x1xf32> to vector<2x4x8x1xf32>
    %28 = vector.broadcast %22 : vector<2x4x1x1xf32> to vector<2x4x8x1xf32>
    %29 = arith.mulf %27, %28 : vector<2x4x8x1xf32>
    %30 = vector.broadcast %6 : vector<2x4x1x1xf32> to vector<2x4x8x1xf32>
    %31 = arith.mulf %30, %29 : vector<2x4x8x1xf32>
    %32 = vector.broadcast %26 : vector<1x4x8x1xf32> to vector<2x4x8x1xf32>
    %33 = arith.subf %32, %31 : vector<2x4x8x1xf32>
    %c0_17 = arith.constant 0 : index
    %c0_18 = arith.constant 0 : index
    %c0_19 = arith.constant 0 : index
    %c0_20 = arith.constant 0 : index
    %34 = vector.load %arg2[%c0_17, %c0_18, %c0_19, %c0_20] : memref<2x4x8x128xf32, #tpu.memory_space<vmem>>, vector<2x4x8x128xf32>
    %35 = vector.broadcast %29 : vector<2x4x8x1xf32> to vector<2x4x8x128xf32>
    %36 = arith.mulf %34, %35 : vector<2x4x8x128xf32>
    %37 = vector.broadcast %33 : vector<2x4x8x1xf32> to vector<2x4x8x128xf32>
    %38 = arith.addf %36, %37 : vector<2x4x8x128xf32>
    %c0_21 = arith.constant 0 : index
    %c0_22 = arith.constant 0 : index
    %c0_23 = arith.constant 0 : index
    %c0_24 = arith.constant 0 : index
    %39 = vector.load %arg5[%c0_21, %c0_22, %c0_23, %c0_24] : memref<2x4x8x128xf32, #tpu.memory_space<vmem>>, vector<2x4x8x128xf32>
    tpu.vector_store %arg5[%c0_21, %c0_22, %c0_23, %c0_24], %38 {strides = array<i32>} : memref<2x4x8x128xf32, #tpu.memory_space<vmem>>, vector<2x4x8x128xf32>,
    return
  }
  func.func @transform_0(%arg0: i32, %arg1: i32) -> (i32, i32, i32, i32) {
    %c0_i32 = arith.constant 0 : i32
    %c0_i32_0 = arith.constant 0 : i32
    %c0_i32_1 = arith.constant 0 : i32
    return %arg1, %arg0, %c0_i32, %c0_i32_0 : i32, i32, i32, i32
  }
  func.func @transform_1(%arg0: i32, %arg1: i32) -> (i32, i32, i32) {
    %c0_i32 = arith.constant 0 : i32
    %c0_i32_0 = arith.constant 0 : i32
    %c0_i32_1 = arith.constant 0 : i32
    return %arg0, %c0_i32, %c0_i32_0 : i32, i32, i32
  }
  func.func @transform_2(%arg0: i32, %arg1: i32) -> (i32, i32, i32) {
    %c0_i32 = arith.constant 0 : i32
    %c0_i32_0 = arith.constant 0 : i32
    %c0_i32_1 = arith.constant 0 : i32
    return %arg0, %c0_i32, %c0_i32_0 : i32, i32, i32
  }
  func.func @transform_3(%arg0: i32, %arg1: i32) -> (i32, i32, i32, i32) {
    %c0_i32 = arith.constant 0 : i32
    %c0_i32_0 = arith.constant 0 : i32
    %c0_i32_1 = arith.constant 0 : i32
    return %arg1, %arg0, %c0_i32, %c0_i32_0 : i32, i32, i32, i32
  }
}

</mosaic_0001>

<bundles_post_ra>
// kernel: tpu_custom_call.1
= control target key start
LH: loop header
LB: loop body
LE: loop exit
PB: predicated region body
PF: predicated region fallthrough
CT: control target
= control target key end

     0   :  { %s673_s0 = inlined_call_operand.vmem [shape: f32[2,4,8,128], index: 0, kind: input, shape index: {}]   ;;  %s674_s1 = inlined_call_operand.vmem [shape: f32[4,8,1], index: 1, kind: input, shape index: {}]   ;;  %s675_s2 = inlined_call_operand.vmem [shape: f32[4,8,1], index: 2, kind: input, shape index: {}]   ;;  %s676_s3 = inlined_call_operand.hbm [shape: f32[2,4,8,128], index: 3, kind: output, shape index: {}]  }
   0x1   :  { %v512_v0 = vld [vmem:[%s673_s0] sm:$0xff]  ;;  %v517_v1 = vld [vmem:[%s673_s0 + $0x10] sm:$0xff]  ;;  %v524_v2 = vld [vmem:[%s673_s0 + $0x8] sm:$0xff] }
   0x2   :  { %23 = vadd.xlane.f32.xlu0 %v512_v0  ;;  %27 = vadd.xlane.f32.xlu1 %v517_v1  ;;  %v529_v3 = vld [vmem:[%s673_s0 + $0x18] sm:$0xff] }
   0x3   :  { %8 = vsyncpa [#allocation3], 0  ;;  %v536_v4 = vld [vmem:[%s673_s0 + $0x20] sm:$0xff]  ;;  %v541_v5 = vld [vmem:[%s673_s0 + $0x28] sm:$0xff] }
   0x4   :  { %v548_v6 = vld [vmem:[%s673_s0 + $0x30] sm:$0xff]  ;;  %v553_v7 = vld [vmem:[%s673_s0 + $0x38] sm:$0xff] }
   0x6   :  { %25 = vadd.xlane.f32.xlu0 %v524_v2  ;;  %29 = vadd.xlane.f32.xlu1 %v529_v3 }
   0xa   :  { %31 = vadd.xlane.f32.xlu0 %v536_v4  ;;  %33 = vadd.xlane.f32.xlu1 %v541_v5 }
   0xe   :  { %35 = vadd.xlane.f32.xlu0 %v548_v6  ;;  %37 = vadd.xlane.f32.xlu1 %v553_v7 }
  0x8f   :  { %v24_v8 = vpop.xlane.xlu0 %23  ;;  %v28_v9 = vpop.xlane.xlu1 %27 }
  0x90   :  { %v39_v10 = vrot.slane %v24_v8, 4  ;;  %v51_v11 = vrot.slane %v28_v9, 4 }
  0x92   :  { %v40_v12 = vadd.f32 %v39_v10, %v24_v8  ;;  %v52_v13 = vadd.f32 %v51_v11, %v28_v9 }
  0x93   :  { %v26_v14 = vpop.xlane.xlu0 %25  ;;  %v30_v15 = vpop.xlane.xlu1 %29 }
  0x94   :  { %v41_v16 = vrot.slane %v40_v12, 2  ;;  %v53_v17 = vrot.slane %v52_v13, 2  ;;  %v45_v18 = vrot.slane %v26_v14, 4  ;;  %v57_v19 = vrot.slane %v30_v15, 4 }
  0x96   :  { %v42_v20 = vadd.f32 %v41_v16, %v40_v12  ;;  %v54_v21 = vadd.f32 %v53_v17, %v52_v13  ;;  %v46_v22 = vadd.f32 %v45_v18, %v26_v14  ;;  %v58_v23 = vadd.f32 %v57_v19, %v30_v15 }
  0x97   :  { %v32_v24 = vpop.xlane.xlu0 %31  ;;  %v34_v25 = vpop.xlane.xlu1 %33 }
  0x98   :  { %v43_v26 = vrot.slane %v42_v20, 1  ;;  %v55_v27 = vrot.slane %v54_v21, 1  ;;  %v47_v28 = vrot.slane %v46_v22, 2  ;;  %v59_v29 = vrot.slane %v58_v23, 2 }
  0x99   :  { %v63_v30 = vrot.slane %v32_v24, 4  ;;  %v69_v31 = vrot.slane %v34_v25, 4 }
  0x9a   :  { %v48_v32 = vadd.f32 %v47_v28, %v46_v22  ;;  %v60_v33 = vadd.f32 %v59_v29, %v58_v23  ;;  %v44_v34 = vadd.f32 %v43_v26, %v42_v20  ;;  %v56_v35 = vadd.f32 %v55_v27, %v54_v21 }
  0x9b   :  { %v64_v36 = vadd.f32 %v63_v30, %v32_v24  ;;  %v70_v37 = vadd.f32 %v69_v31, %v34_v25  ;;  %v36_v38 = vpop.xlane.xlu0 %35  ;;  %v38_v39 = vpop.xlane.xlu1 %37 }
  0x9c   :  { %v49_v40 = vrot.slane %v48_v32, 1  ;;  %v61_v41 = vrot.slane %v60_v33, 1  ;;  %v75_v42 = vrot.slane %v36_v38, 4  ;;  %v81_v43 = vrot.slane %v38_v39, 4 }
  0x9d   :  { %v65_v44 = vrot.slane %v64_v36, 2  ;;  %v71_v45 = vrot.slane %v70_v37, 2  ;;  %v557_v46 = vmul.f32 0.0009765625, %v44_v34  ;;  %v559_v47 = vmul.f32 0.0009765625, %v56_v35 }
  0x9e   :  { %v76_v48 = vadd.f32 %v75_v42, %v36_v38  ;;  %v82_v49 = vadd.f32 %v81_v43, %v38_v39  ;;  %v50_v50 = vadd.f32 %v49_v40, %v48_v32  ;;  %v62_v51 = vadd.f32 %v61_v41, %v60_v33 }
  0x9f   :  { %v66_v52 = vadd.f32 %v65_v44, %v64_v36  ;;  %v72_v53 = vadd.f32 %v71_v45, %v70_v37  ;;  %v95_v54 = vsub.f32 %v512_v0, %v557_v46  ;;  %v97_v62 = vsub.f32 %v517_v1, %v559_v47 }
  0xa0   :  { %v77_v55 = vrot.slane %v76_v48, 2  ;;  %v83_v56 = vrot.slane %v82_v49, 2  ;;  %v563_v57 = vmul.f32 0.0009765625, %v50_v50  ;;  %v565_v58 = vmul.f32 0.0009765625, %v62_v51 }
  0xa1   :  { %v67_v59 = vrot.slane %v66_v52, 1  ;;  %v73_v60 = vrot.slane %v72_v53, 1  ;;  %v103_v61 = vmul.f32 %v95_v54, %v95_v54  ;;  %v105_v16 = vmul.f32 %v97_v62, %v97_v62 }
  0xa2   :  { %v78_v63 = vadd.f32 %v77_v55, %v76_v48  ;;  %v84_v8 = vadd.f32 %v83_v56, %v82_v49  ;;  %v96_v9 = vsub.f32 %v524_v2, %v563_v57  ;;  %v98_v15 = vsub.f32 %v529_v3, %v565_v58 }
  0xa3   :  { %111 = vadd.xlane.f32.xlu0 %v103_v61  ;;  %v68_v10 = vadd.f32 %v67_v59, %v66_v52  ;;  %v74_v11 = vadd.f32 %v73_v60, %v72_v53  ;;  %v485_v32 = vmov 0  }
  0xa4   :  { %v79_v12 = vrot.slane %v78_v63, 1  ;;  %v85_v13 = vrot.slane %v84_v8, 1  ;;  %v104_v14 = vmul.f32 %v96_v9, %v96_v9  ;;  %v106_v23 = vmul.f32 %v98_v15, %v98_v15  ;;  %427 = vset.pattern.permute.xlu0 %v485_v32  ;;  %428 = vset.pattern.permute.xlu1 %v485_v32 }
  0xa5   :  { %v573_v17 = vmul.f32 0.0009765625, %v68_v10  ;;  %v575_v18 = vmul.f32 0.0009765625, %v74_v11 }
  0xa6   :  { %113 = vadd.xlane.f32.xlu1 %v104_v14  ;;  %v80_v19 = vadd.f32 %v79_v12, %v78_v63  ;;  %v86_v20 = vadd.f32 %v85_v13, %v84_v8 }
  0xa7   :  { %115 = vadd.xlane.f32.xlu0 %v105_v16  ;;  %v99_v21 = vsub.f32 %v536_v4, %v573_v17  ;;  %v100_v22 = vsub.f32 %v541_v5, %v575_v18 }
  0xa8   :  { %v581_v24 = vmul.f32 0.0009765625, %v80_v19  ;;  %v583_v25 = vmul.f32 0.0009765625, %v86_v20 }
  0xa9   :  { %v107_v26 = vmul.f32 %v99_v21, %v99_v21  ;;  %v108_v27 = vmul.f32 %v100_v22, %v100_v22 }
  0xaa   :  { %117 = vadd.xlane.f32.xlu1 %v106_v23  ;;  %v101_v28 = vsub.f32 %v548_v6, %v581_v24  ;;  %v102_v29 = vsub.f32 %v553_v7, %v583_v25 }
  0xab   :  { %119 = vadd.xlane.f32.xlu0 %v107_v26 }
  0xac   :  { %v109_v30 = vmul.f32 %v101_v28, %v101_v28  ;;  %v110_v31 = vmul.f32 %v102_v29, %v102_v29 }
  0xae   :  { %121 = vadd.xlane.f32.xlu1 %v108_v27 }
  0xaf   :  { %123 = vadd.xlane.f32.xlu0 %v109_v30 }
  0xb2   :  { %125 = vadd.xlane.f32.xlu1 %v110_v31 }
 0x130   :  { %v112_v33 = vpop.xlane.xlu0 %111 }
 0x131   :  { %v127_v34 = vrot.slane %v112_v33, 4 }
 0x133   :  { %v128_v35 = vadd.f32 %v127_v34, %v112_v33  ;;  %v114_v36 = vpop.xlane.xlu1 %113 }
 0x134   :  { %v133_v37 = vrot.slane %v114_v36, 4  ;;  %v116_v38 = vpop.xlane.xlu0 %115 }
 0x135   :  { %v129_v39 = vrot.slane %v128_v35, 2  ;;  %v139_v40 = vrot.slane %v116_v38, 4 }
 0x136   :  { %v134_v41 = vadd.f32 %v133_v37, %v114_v36 }
 0x137   :  { %v130_v42 = vadd.f32 %v129_v39, %v128_v35  ;;  %v140_v43 = vadd.f32 %v139_v40, %v116_v38  ;;  %v118_v44 = vpop.xlane.xlu1 %117 }
 0x138   :  { %v135_v45 = vrot.slane %v134_v41, 2  ;;  %v145_v48 = vrot.slane %v118_v44, 4  ;;  %v120_v49 = vpop.xlane.xlu0 %119 }
 0x139   :  { %v131_v50 = vrot.slane %v130_v42, 1  ;;  %v141_v51 = vrot.slane %v140_v43, 2  ;;  %v151_v52 = vrot.slane %v120_v49, 4 }
 0x13a   :  { %v136_v53 = vadd.f32 %v135_v45, %v134_v41  ;;  %v146_v54 = vadd.f32 %v145_v48, %v118_v44 }
 0x13b   :  { %v132_v55 = vadd.f32 %v131_v50, %v130_v42  ;;  %v142_v56 = vadd.f32 %v141_v51, %v140_v43  ;;  %v152_v59 = vadd.f32 %v151_v52, %v120_v49  ;;  %v122_v60 = vpop.xlane.xlu1 %121 }
 0x13c   :  { %v137_v61 = vrot.slane %v136_v53, 1  ;;  %v147_v62 = vrot.slane %v146_v54, 2  ;;  %v157_v63 = vrot.slane %v122_v60, 4  ;;  %v124_v8 = vpop.xlane.xlu0 %123 }
 0x13d   :  { %v175_v9 = vmul.f32 0.0009775171, %v132_v55  ;;  %v143_v10 = vrot.slane %v142_v56, 1  ;;  %v153_v11 = vrot.slane %v152_v59, 2  ;;  %v163_v12 = vrot.slane %v124_v8, 4 }
 0x13e   :  { %v138_v13 = vadd.f32 %v137_v61, %v136_v53  ;;  %v148_v14 = vadd.f32 %v147_v62, %v146_v54  ;;  %v158_v15 = vadd.f32 %v157_v63, %v122_v60 }
 0x13f   :  { %v183_v16 = vmax.f32 %v175_v9, 0.0  ;;  %v144_v19 = vadd.f32 %v143_v10, %v142_v56  ;;  %v154_v20 = vadd.f32 %v153_v11, %v152_v59  ;;  %v164_v21 = vadd.f32 %v163_v12, %v124_v8  ;;  %v126_v22 = vpop.xlane.xlu1 %125 }
 0x140   :  { %v176_v23 = vmul.f32 0.0009775171, %v138_v13  ;;  %v149_v26 = vrot.slane %v148_v14, 1  ;;  %v159_v27 = vrot.slane %v158_v15, 2  ;;  %v169_v28 = vrot.slane %v126_v22, 4 }
 0x141   :  { %429 = vrsqrt.f32 %v183_v16  ;;  %v177_v29 = vmul.f32 0.0009775171, %v144_v19  ;;  %v155_v30 = vrot.slane %v154_v20, 1  ;;  %v165_v31 = vrot.slane %v164_v21, 2 }
 0x142   :  { %v184_v32 = vmax.f32 %v176_v23, 0.0  ;;  %v150_v33 = vadd.f32 %v149_v26, %v148_v14  ;;  %v160_v34 = vadd.f32 %v159_v27, %v158_v15  ;;  %v170_v35 = vadd.f32 %v169_v28, %v126_v22 }
 0x143   :  { %v185_v36 = vmax.f32 %v177_v29, 0.0  ;;  %v156_v37 = vadd.f32 %v155_v30, %v154_v20  ;;  %v166_v38 = vadd.f32 %v165_v31, %v164_v21  ;;  %vm193_vm0 = vcmp.eq.f32.partialorder %v183_v16, inf }
 0x144   :  { %431 = vrsqrt.f32 %v184_v32  ;;  %v178_v39 = vmul.f32 0.0009775171, %v150_v33  ;;  %v161_v40 = vrot.slane %v160_v34, 1  ;;  %v171_v41 = vrot.slane %v170_v35, 2 }
 0x145   :  { %433 = vrsqrt.f32 %v185_v36  ;;  %v179_v42 = vmul.f32 0.0009775171, %v156_v37  ;;  %v167_v43 = vrot.slane %v166_v38, 1  ;;  %v196_v62 = vand.u32 2147483648, %v183_v16 }
 0x146   :  { %v186_v44 = vmax.f32 %v178_v39, 0.0  ;;  %v162_v45 = vadd.f32 %v161_v40, %v160_v34  ;;  %v172_v48 = vadd.f32 %v171_v41, %v170_v35  ;;  %vm195_vm1 = vcmp.eq.f32.partialorder %v183_v16, 0.0 }
 0x147   :  { %v589_v49 = vmax.f32 %v179_v42, 0.0  ;;  %v168_v50 = vadd.f32 %v167_v43, %v166_v38  ;;  %vm200_vm2 = vcmp.eq.f32.partialorder %v184_v32, inf  ;;  %v203_v14 = vand.u32 2147483648, %v184_v32 }
 0x148   :  { %435 = vrsqrt.f32 %v186_v44  ;;  %v180_v51 = vmul.f32 0.0009775171, %v162_v45  ;;  %v173_v52 = vrot.slane %v172_v48, 1  ;;  %vm202_vm3 = vcmp.eq.f32.partialorder %v184_v32, 0.0  ;;  %v271_v45 = vld [vmem:[%s674_s1] sm:$0xff] }
 0x149   :  { %437 = vrsqrt.f32 %v589_v49  ;;  %v181_v53 = vmul.f32 0.0009775171, %v168_v50  ;;  %vm207_vm4 = vcmp.eq.f32.partialorder %v185_v36, inf  ;;  %v210_v20 = vand.u32 2147483648, %v185_v36 }
 0x14a   :  { %v592_v54 = vmax.f32 %v180_v51, 0.0  ;;  %v174_v55 = vadd.f32 %v173_v52, %v172_v48  ;;  %vm209_vm5 = vcmp.eq.f32.partialorder %v185_v36, 0.0  ;;  %vm214_vm6 = vcmp.eq.f32.partialorder %v186_v44, inf }
 0x14b   :  { %v430_v56 = vpop.eup %429  ;;  %v594_v59 = vmax.f32 %v181_v53, 0.0  ;;  %v217_v30 = vand.u32 2147483648, %v186_v44  ;;  %vm216_vm7 = vcmp.eq.f32.partialorder %v186_v44, 0.0  ;;  %vm221_vm8 = vcmp.eq.f32.partialorder %v589_v49, inf }
 0x14c   :  { %439 = vrsqrt.f32 %v592_v54  ;;  %v182_v60 = vmul.f32 0.0009775171, %v174_v55  ;;  %v192_v61 = vmul.f32 %v430_v56, %v183_v16  ;;  %vm223_vm9 = vcmp.eq.f32.partialorder %v589_v49, 0.0  ;;  %v272_v55 = vld [vmem:[%s674_s1 + $0x8] sm:$0xff] }
 0x14d   :  { %441 = vrsqrt.f32 %v594_v59  ;;  %vm228_vm10 = vcmp.eq.f32.partialorder %v592_v54, inf  ;;  %v231_v40 = vand.u32 2147483648, %v592_v54  ;;  %vm230_vm11 = vcmp.eq.f32.partialorder %v592_v54, 0.0 }
 0x14e   :  { %v432_v63 = vpop.eup %431  ;;  %v598_v8 = vmax.f32 %v182_v60, 0.0  ;;  %v194_v9 = vsel %vm193_vm0, %v183_v16, %v192_v61  ;;  %vm235_vm14 = vcmp.eq.f32.partialorder %v594_v59, inf  ;;  %vm237_vm15 = vcmp.eq.f32.partialorder %v594_v59, 0.0 }
 0x14f   :  { %v434_v10 = vpop.eup %433  ;;  %v197_v11 = vsel %vm195_vm1, %v196_v62, %v194_v9  ;;  %v199_v12 = vmul.f32 %v432_v63, %v184_v32  ;;  %v238_v62 = vand.u32 2147483648, %v594_v59 }
 0x150   :  { %443 = vrsqrt.f32 %v598_v8  ;;  %v247_v13 = vadd.f32 1e-10, %v197_v11  ;;  %v206_v15 = vmul.f32 %v434_v10, %v185_v36  ;;  %vm242_vm12 = vcmp.eq.f32.partialorder %v598_v8, inf }
 0x151   :  { %v201_v19 = vsel %vm200_vm2, %v184_v32, %v199_v12  ;;  %vm244_vm13 = vcmp.eq.f32.partialorder %v598_v8, 0.0  ;;  %v245_v53 = vand.u32 2147483648, %v598_v8 }
 0x152   :  { %v436_v21 = vpop.eup %435  ;;  %445 = vrcp.f32 %v247_v13  ;;  %v204_v22 = vsel %vm202_vm3, %v203_v14, %v201_v19  ;;  %v208_v23 = vsel %vm207_vm4, %v185_v36, %v206_v15  ;;  %v224_v36 = vand.u32 2147483648, %v589_v49  ;;  %v276_v13 = vld [vmem:[%s675_s2 + $0x8] sm:$0xff]  ;;  %v274_v14 = vld [vmem:[%s674_s1 + $0x18] sm:$0xff] }
 0x153   :  { %v438_v26 = vpop.eup %437  ;;  %v213_v16 = vmul.f32 %v436_v21, %v186_v44  ;;  %v248_v27 = vadd.f32 1e-10, %v204_v22  ;;  %v211_v28 = vsel %vm209_vm5, %v210_v20, %v208_v23  ;;  %v278_v23 = vld [vmem:[%s675_s2 + $0x18] sm:$0xff] }
 0x154   :  { %v249_v29 = vadd.f32 1e-10, %v211_v28  ;;  %v220_v31 = vmul.f32 %v438_v26, %v589_v49 }
 0x155   :  { %447 = vrcp.f32 %v248_v27  ;;  %v215_v33 = vsel %vm214_vm6, %v186_v44, %v213_v16 }
 0x156   :  { %v440_v32 = vpop.eup %439  ;;  %v218_v34 = vsel %vm216_vm7, %v217_v30, %v215_v33  ;;  %v222_v35 = vsel %vm221_vm8, %v589_v49, %v220_v31  ;;  %449 = vrcp.f32 %v249_v29 }
 0x157   :  { %v442_v37 = vpop.eup %441  ;;  %v227_v38 = vmul.f32 %v440_v32, %v592_v54  ;;  %v250_v39 = vadd.f32 1e-10, %v218_v34  ;;  %v225_v41 = vsel %vm223_vm9, %v224_v36, %v222_v35 }
 0x158   :  { %v234_v43 = vmul.f32 %v442_v37, %v594_v59  ;;  %v251_v51 = vadd.f32 1e-10, %v225_v41 }
 0x159   :  { %v229_v42 = vsel %vm228_vm10, %v592_v54, %v227_v38  ;;  %451 = vrcp.f32 %v250_v39 }
 0x15a   :  { %v444_v44 = vpop.eup %443  ;;  %v232_v48 = vsel %vm230_vm11, %v231_v40, %v229_v42  ;;  %v236_v60 = vsel %vm235_vm14, %v594_v59, %v234_v43 }
 0x15b   :  { %v241_v49 = vmul.f32 %v444_v44, %v598_v8  ;;  %v252_v50 = vadd.f32 1e-10, %v232_v48  ;;  %v239_v11 = vsel %vm237_vm15, %v238_v62, %v236_v60 }
 0x15c   :  { %v446_v52 = vpop.eup %445  ;;  %v253_v19 = vadd.f32 1e-10, %v239_v11 }
 0x15d   :  { %v279_v54 = vmul.f32 %v446_v52, %v271_v45  ;;  %453 = vrcp.f32 %v252_v50  ;;  %v243_v56 = vsel %vm242_vm12, %v598_v8, %v241_v49  ;;  %v273_v8 = vld [vmem:[%s674_s1 + $0x10] sm:$0xff] }
 0x15e   :  { %v246_v61 = vsel %vm244_vm13, %v245_v53, %v243_v56  ;;  %455 = vrcp.f32 %v251_v51 }
 0x15f   :  { %v448_v63 = vpop.eup %447  ;;  %305 = vperm.xlu0 %427, %v279_v54   ;;  %v254_v9 = vadd.f32 1e-10, %v246_v61  ;;  %v287_v37 = vmul.f32 %v279_v54, %v557_v46 }
 0x160   :  { %v280_v10 = vmul.f32 %v448_v63, %v272_v55  ;;  %v450_v12 = vpop.eup %449 }
 0x161   :  { %457 = vrcp.f32 %v254_v9  ;;  %v281_v21 = vmul.f32 %v450_v12, %v273_v8 }
 0x162   :  { %310 = vperm.xlu1 %428, %v280_v10   ;;  %v288_v15 = vmul.f32 %v280_v10, %v563_v57  ;;  %459 = vrcp.f32 %v253_v19 }
 0x163   :  { %v452_v59 = vpop.eup %451  ;;  %v289_v39 = vmul.f32 %v281_v21, %v559_v47 }
 0x164   :  { %v296_v20 = vsub.f32 %v276_v13, %v288_v15  ;;  %v282_v22 = vmul.f32 %v452_v59, %v274_v14 }
 0x166   :  { %358 = vperm.xlu0 %427, %v296_v20   ;;  %315 = vperm.xlu1 %428, %v281_v21   ;;  %v290_v26 = vmul.f32 %v282_v22, %v565_v58 }
 0x167   :  { %v454_v16 = vpop.eup %453 }
 0x168   :  { %v284_v27 = vmul.f32 %v454_v16, %v272_v55  ;;  %v298_v28 = vsub.f32 %v278_v23, %v290_v26  ;;  %v456_v29 = vpop.eup %455 }
 0x169   :  { %v283_v33 = vmul.f32 %v456_v29, %v271_v45 }
 0x16a   :  { %368 = vperm.xlu0 %427, %v298_v28   ;;  %320 = vperm.xlu1 %428, %v282_v22   ;;  %v292_v57 = vmul.f32 %v284_v27, %v575_v18  ;;  %v275_v18 = vld [vmem:[%s675_s2] sm:$0xff] }
 0x16b   :  { %v458_v30 = vpop.eup %457  ;;  %v295_v38 = vsub.f32 %v275_v18, %v287_v37  ;;  %v291_v41 = vmul.f32 %v283_v33, %v573_v17 }
 0x16c   :  { %v300_v31 = vsub.f32 %v276_v13, %v292_v57  ;;  %v286_v32 = vmul.f32 %v458_v30, %v274_v14  ;;  %v460_v36 = vpop.eup %459 }
 0x16d   :  { %v285_v58 = vmul.f32 %v460_v36, %v273_v8  ;;  %v299_v42 = vsub.f32 %v275_v18, %v291_v41 }
 0x16e   :  { %378 = vperm.xlu0 %427, %v300_v31   ;;  %325 = vperm.xlu1 %428, %v283_v33   ;;  %v294_v34 = vmul.f32 %v286_v32, %v583_v25  ;;  %v277_v25 = vld [vmem:[%s675_s2 + $0x10] sm:$0xff]  ;;  %s486_s2 = smov [#allocation2]  }
 0x16f   :  { %v297_v40 = vsub.f32 %v277_v25, %v289_v39  ;;  %v293_v46 = vmul.f32 %v285_v58, %v581_v24  ;;  %s412_s15 = sshll.u32 %s486_s2, 4  ;;  %s413_s15 = int_to_ptr.vmem [resolvable:$true] %s412_s15 }
 0x170   :  { %v302_v35 = vsub.f32 %v278_v23, %v294_v34  ;;  %s461_s16 = scalar_lea.vmem %s413_s15, 1024  ;;  %p466_p1 = scmp.lt.s32.totalorder %s413_s15, %s413_s15 }
 0x171   :  { %v301_v43 = vsub.f32 %v277_v25, %v293_v46  ;;  %p462_p0 = scmp.ne.s32.totalorder %s413_s15, %s461_s16  ;;  %p467_p2 = scmp.lt.s32.totalorder %s461_s16, %s461_s16 }
 0x172   :  { %388 = vperm.xlu0 %427, %v302_v35   ;;  %330 = vperm.xlu1 %428, %v284_v27  }
 0x173   :  { %p468_p3 = por %p467_p2, %p466_p1 }
 0x175   :  { %p469_p4 = pnand %p468_p3, %p462_p0 }
 0x176   :  { %335 = vperm.xlu1 %428, %v285_v58  }
 0x17a   :  { %340 = vperm.xlu1 %428, %v286_v32  }
 0x17e   :  { %353 = vperm.xlu1 %428, %v295_v38  }
 0x182   :  { %363 = vperm.xlu1 %428, %v297_v40  }
 0x186   :  { %373 = vperm.xlu1 %428, %v299_v42  }
 0x18a   :  { %383 = vperm.xlu1 %428, %v301_v43  }
 0x1de   :  { %v306_v44 = vpop.permute.xlu0 %305 }
 0x1df   :  { %v343_v9 = vmul.f32 %v306_v44, %v512_v0 }
 0x1e1   :  { %v311_v45 = vpop.permute.xlu1 %310 }
 0x1e2   :  { %v344_v48 = vmul.f32 %v311_v45, %v524_v2 }
 0x1e5   :  { %v316_v47 = vpop.permute.xlu1 %315  ;;  %v359_v49 = vpop.permute.xlu0 %358 }
 0x1e6   :  { %v392_v50 = vadd.f32 %v359_v49, %v344_v48  ;;  %v345_v12 = vmul.f32 %v316_v47, %v517_v1 }
 0x1e8   :  { %400 = vst [vmem:[#allocation2 + $0x8] sm:$0xff] %v392_v50 }
 0x1e9   :  { %v321_v51 = vpop.permute.xlu1 %320  ;;  %v369_v53 = vpop.permute.xlu0 %368 }
 0x1ea   :  { %v346_v52 = vmul.f32 %v321_v51, %v529_v3 }
 0x1ec   :  { %v394_v17 = vadd.f32 %v369_v53, %v346_v52 }
 0x1ed   :  { %v326_v54 = vpop.permute.xlu1 %325  ;;  %v379_v56 = vpop.permute.xlu0 %378 }
 0x1ee   :  { %402 = vst [vmem:[#allocation2 + $0x18] sm:$0xff] %v394_v17 }
 0x1f1   :  { %v331_v55 = vpop.permute.xlu1 %330  ;;  %v389_v63 = vpop.permute.xlu0 %388 }
 0x1f2   :  { %v348_v24 = vmul.f32 %v331_v55, %v541_v5  ;;  %v347_v5 = vmul.f32 %v326_v54, %v536_v4 }
 0x1f4   :  { %v396_v60 = vadd.f32 %v379_v56, %v348_v24 }
 0x1f5   :  { %v336_v61 = vpop.permute.xlu1 %335 }
 0x1f6   :  { %404 = vst [vmem:[#allocation2 + $0x28] sm:$0xff] %v396_v60 }
 0x1f9   :  { %v341_v62 = vpop.permute.xlu1 %340 }
 0x1fa   :  { %v350_v2 = vmul.f32 %v341_v62, %v553_v7  ;;  %v349_v7 = vmul.f32 %v336_v61, %v548_v6 }
 0x1fc   :  { %v398_v10 = vadd.f32 %v389_v63, %v350_v2 }
 0x1fd   :  { %v354_v11 = vpop.permute.xlu1 %353 }
 0x1fe   :  { %406 = vst [vmem:[#allocation2 + $0x38] sm:$0xff] %v398_v10  ;;  %v391_v3 = vadd.f32 %v354_v11, %v343_v9 }
 0x200   :  { %399 = vst [vmem:[#allocation2] sm:$0xff] %v391_v3 }
 0x201   :  { %v364_v13 = vpop.permute.xlu1 %363 }
 0x202   :  { %v393_v8 = vadd.f32 %v364_v13, %v345_v12 }
 0x204   :  { %401 = vst [vmem:[#allocation2 + $0x10] sm:$0xff] %v393_v8 }
 0x205   :  { %v374_v14 = vpop.permute.xlu1 %373 }
 0x206   :  { %v395_v15 = vadd.f32 %v374_v14, %v347_v5 }
 0x208   :  { %403 = vst [vmem:[#allocation2 + $0x20] sm:$0xff] %v395_v15 }
 0x209   :  { %v384_v0 = vpop.permute.xlu1 %383 }
 0x20a   :  { %v397_v59 = vadd.f32 %v384_v0, %v349_v7 }
 0x20c   :  { %405 = vst [vmem:[#allocation2 + $0x30] sm:$0xff] %v397_v59 }
 0x20d   :  { %472 = shalt.err (!%p469_p4)
}
 0x20e   :  { %s473_s19 = scalar_lea.hbm %s676_s3, 1024 }
 0x20f   :  { %p474_p5 = scmp.ne.s32.totalorder %s676_s3, %s473_s19  ;;  %p477_p6 = scmp.lt.u32.totalorder %s473_s19, %s676_s3 }
 0x211   :  { %p479_p7 = pnand %p477_p6, %p474_p5 }
 0x213   :  { %482 = shalt.err (!%p479_p7)
}
 0x214   :  { %s487_s24 = smov 128   ;;  %s488_s25 = smov 8  }
 0x215   :  { %418 = dma.vmem_to_hbm [thread:$0]  %s413_s15, 1024, %s676_s3, [#allocation3], %s487_s24, %s487_s24, %s488_s25  }
 0x216   :  { %483 = dma.done.wait [#allocation3], 1024  }
 0x217   :  { %484 = vsyncadd [#allocation3], 4294966272 }
 0x218   :  { %422 = vsyncpa [#allocation3], 1 }

</bundles_post_ra>
